<compile_context>
chip_gen: v7x
topology: tpu7x:2x2x1
jax: 0.10.0
libtpu: 0.0.40
codegen_flags: <defaults>
</compile_context>

<pallas_src>
import math

import jax
import jax.numpy as jnp
import numpy as np
from jax.experimental import pallas as pl
from jax.experimental.pallas import tpu as pltpu


def _round_up(x, m):
    return ((x + m - 1) // m) * m


def dw_conv2d_forward(x_nchw, params, *, kernel_size, ratio=0.25, stride=1,
                      padding=0, dilation=1, groups=1, K=4, temperature=34,
                      row_tile=16):
    """Pallas implementation of dw_conv2d.forward (bias=True, 'kaiming' init)."""
    assert temperature % 3 == 1
    # TODO(synk): stride>1, dilation>1 and grouped conv (groups>1) not implemented.
    assert stride == 1 and dilation == 1 and groups == 1

    B, Cin, H, W = x_nchw.shape
    ksz = kernel_size
    Cout = params["weight"].shape[1]
    hidden = params["fc1_w"].shape[0]
    xf = x_nchw.astype(jnp.float32)

    # ---------------- maker: hoisted to plain JAX (tiny GEMMs) ----------------
    pooled = jnp.mean(xf, axis=(2, 3))                                   # (B, Cin)
    w1 = params["fc1_w"].reshape(hidden, Cin).astype(jnp.float32)
    b1 = params["fc1_b"].reshape(hidden).astype(jnp.float32)
    w2 = params["fc2_w"].reshape(K, hidden).astype(jnp.float32)
    b2 = params["fc2_b"].reshape(K).astype(jnp.float32)
    h = jax.nn.relu(pooled @ w1.T + b1[None, :])
    logits = h @ w2.T + b2[None, :]
    attn = jax.nn.softmax(logits / float(temperature), axis=1)           # (B, K)

    # Per-batch aggregated conv weight / bias (single contractions over K).
    wflat = params["weight"].reshape(K, -1).astype(jnp.float32)
    agg = (attn @ wflat).reshape(B, Cout, Cin, ksz, ksz)
    # (B, Cout, Cin, kh, kw) -> (B, kh, kw, Cin, Cout) -> (B, ksz^2*Cin, Cout)
    # K-index ordering = (kh, kw, ci), matching the LHS built by the kernel.
    agg = jnp.transpose(agg, (0, 3, 4, 2, 1)).reshape(B, ksz * ksz * Cin, Cout)
    Cp = _round_up(Cout, 128)
    agg_w = jnp.pad(agg, ((0, 0), (0, 0), (0, Cp - Cout))).astype(jnp.bfloat16)
    agg_b = attn @ params["bias"].astype(jnp.float32)                    # (B, Cout)
    agg_b = jnp.pad(agg_b, ((0, 0), (0, Cp - Cout))).reshape(B, 1, Cp)   # f32

    # -------- image prep: NHWC, conv padding, width im2col (kw -> lanes) -------
    # NOTE: the avg-pool above used the ORIGINAL x, so padding never affects
    # the maker.
    x_nhwc = jnp.transpose(xf, (0, 2, 3, 1))
    if padding > 0:
        x_nhwc = jnp.pad(
            x_nhwc, ((0, 0), (padding, padding), (padding, padding), (0, 0)))
    Hc, Wc = H + 2 * padding, W + 2 * padding
    Ho, Wo = Hc - ksz + 1, Wc - ksz + 1

    # lane index = kw*Cin + ci ; entries with w+kw >= Wc are zero (sliced later).
    xw = jnp.pad(x_nhwc, ((0, 0), (0, 0), (0, ksz - 1), (0, 0)))
    cols = [xw[:, :, kw:kw + Wc, :] for kw in range(ksz)]
    x_exp = cols[0] if ksz == 1 else jnp.concatenate(cols, axis=-1)      # (B,Hc,Wc,Cexp)
    x_exp = x_exp.astype(jnp.bfloat16)
    Cexp = ksz * Cin

    Wp = _round_up(Wc, 8)                 # 8-aligned flattened row stride
    TH = max(1, min(row_tile, _round_up(Ho, 8)))   # output rows per grid step
    NT = -(-Ho // TH)
    Hp = NT * TH + ksz - 1                # rows incl. the last tile's halo
    x_exp = jnp.pad(x_exp, ((0, 0), (0, Hp - Hc), (0, Wp - Wc), (0, 0)))

    rows_in = (TH + ksz - 1) * Wp         # slab rows incl. kh halo (mult of 8)
    rows_out = TH * Wp                    # M of the per-tile matmul (mult of 8)

    # Slab-tile x with overlapping halo rows: (B, NT, rows_in, Cexp).
    ridx = (jnp.arange(NT)[:, None] * TH
            + jnp.arange(TH + ksz - 1)[None, :]).reshape(-1)
    x_tiled = jnp.take(x_exp, ridx, axis=1).reshape(B, NT, rows_in, Cexp)

    def kernel(x_ref, w_ref, b_ref, o_ref):
        # x_ref: (rows_in, Cexp) bf16 slab (incl. halo)   w_ref: (ksz^2*Cin, Cp) bf16
        # b_ref: (1, Cp) f32                              o_ref: (rows_out, Cp) bf16
        xs = x_ref[...]                                   # stays bf16
        # kh taps = ksz 8-aligned static slices of the slab (kh*Wp, Wp % 8 == 0),
        # folded into the contraction dim via one lane concat -> single MXU dot.
        parts = [xs[kh * Wp: kh * Wp + rows_out, :] for kh in range(ksz)]
        lhs = parts[0] if ksz == 1 else jnp.concatenate(parts, axis=-1)
        acc = jnp.dot(lhs, w_ref[...], preferred_element_type=jnp.float32)
        # Single bias broadcast + single lane-dense bf16 store per tile.
        o_ref[...] = (acc + b_ref[...]).astype(o_ref.dtype)

    flops = 2 * B * Ho * Wo * ksz * ksz * Cin * Cout
    bytes_accessed = (B * NT * rows_in * Cexp * 2           # x slabs (bf16)
                      + B * (ksz * ksz * Cin) * Cp * 2      # weights (bf16)
                      + B * Cp * 4                          # bias (f32)
                      + B * NT * rows_out * Cp * 2)         # output (bf16)

    out = pl.pallas_call(
        kernel,
        out_shape=jax.ShapeDtypeStruct((B, NT * rows_out, Cp), jnp.bfloat16),
        grid=(B, NT),
        in_specs=[
            pl.BlockSpec((None, None, rows_in, Cexp), lambda b, t: (b, t, 0, 0)),
            pl.BlockSpec((None, ksz * ksz * Cin, Cp), lambda b, t: (b, 0, 0)),
            pl.BlockSpec((None, 1, Cp), lambda b, t: (b, 0, 0)),
        ],
        out_specs=pl.BlockSpec((None, rows_out, Cp), lambda b, t: (b, t, 0)),
        compiler_params=pltpu.CompilerParams(
            dimension_semantics=("parallel", "parallel"),
            vmem_limit_bytes=48 * 1024 * 1024),
        cost_estimate=pl.CostEstimate(flops=flops, transcendentals=0,
                                      bytes_accessed=bytes_accessed),
    )(x_tiled, agg_w, agg_b)

    # Strip padded channels / garbage columns+rows, back to NCHW (f32).
    out = out.reshape(B, NT * TH, Wp, Cp)[:, :Ho, :Wo, :Cout].astype(jnp.float32)
    return jnp.transpose(out, (0, 3, 1, 2))


def dw_conv2d_reference(x, params, *, kernel_size, stride=1, padding=0,
                        K=4, temperature=34):
    """Pure-JAX reference matching the PyTorch forward (NCHW)."""
    B, Cin, H, W = x.shape
    Cout = params["weight"].shape[1]
    hidden = params["fc1_w"].shape[0]
    pooled = jnp.mean(x, axis=(2, 3))                                    # (B, Cin)
    h = jax.nn.relu(pooled @ params["fc1_w"].reshape(hidden, Cin).T
                    + params["fc1_b"].reshape(1, hidden))
    logits = (h @ params["fc2_w"].reshape(K, hidden).T
              + params["fc2_b"].reshape(1, K))
    attn = jax.nn.softmax(logits / temperature, axis=1)                  # (B, K)
    agg_w = (attn @ params["weight"].reshape(K, -1)).reshape(
        B * Cout, Cin, kernel_size, kernel_size)
    agg_b = (attn @ params["bias"]).reshape(-1)                          # (B*Cout,)
    outs = []
    for b in range(B):
        wb = agg_w[b * Cout:(b + 1) * Cout]
        y = jax.lax.conv_general_dilated(
            x[b:b + 1], wb, window_strides=(stride, stride),
            padding=[(padding, padding), (padding, padding)],
            dimension_numbers=("NCHW", "OIHW", "NCHW"))
        y = y + agg_b[b * Cout:(b + 1) * Cout][None, :, None, None]
        outs.append(y)
    return jnp.concatenate(outs, axis=0)


if __name__ == "__main__":
    # Small shapes consistent with the module (groups=1, padding=0, stride=1).
    B, Cin, H, W = 2, 4, 16, 16
    Cout, ksz, K, temperature, ratio, groups = 8, 3, 4, 34, 0.25, 1
    hidden = K if Cin == 3 else int(Cin * ratio) + 1                     # == 2

    key = jax.random.PRNGKey(0)
    k1, k2, k3, k4, k5 = jax.random.split(key, 5)

    # maker params: kaiming_normal (fan_out) 1x1 convs, zero biases.
    fc1_w = jax.random.normal(k1, (hidden, Cin), jnp.float32) * math.sqrt(2.0 / hidden)
    fc1_b = jnp.zeros((hidden,), jnp.float32)
    fc2_w = jax.random.normal(k2, (K, hidden), jnp.float32) * math.sqrt(2.0 / K)
    fc2_b = jnp.zeros((K,), jnp.float32)

    # dynamic weight bank: cfg.dynamic_weight.init == "kaiming"
    bound_w = math.sqrt(6.0 / (Cin * ksz * ksz))
    weight = jax.random.uniform(k3, (K, Cout, Cin, ksz, ksz), jnp.float32,
                                minval=-bound_w, maxval=bound_w)
    bound_b = math.sqrt(groups / (ksz * ksz * Cin))
    bias = jax.random.uniform(k4, (K, Cout), jnp.float32,
                              minval=-bound_b, maxval=bound_b)

    params = dict(fc1_w=fc1_w, fc1_b=fc1_b, fc2_w=fc2_w, fc2_b=fc2_b,
                  weight=weight, bias=bias)

    x = jax.random.normal(k5, (B, Cin, H, W), jnp.float32)               # NCHW

    out = dw_conv2d_forward(x, params, kernel_size=ksz, ratio=ratio, stride=1,
                            padding=0, groups=groups, K=K,
                            temperature=temperature)
    out = jax.block_until_ready(out)

    ref = dw_conv2d_reference(x, params, kernel_size=ksz, stride=1, padding=0,
                              K=K, temperature=temperature)
    ref = jax.block_until_ready(ref)

    assert out.shape == (B, Cout, H - ksz + 1, W - ksz + 1)
    np.testing.assert_allclose(np.asarray(out), np.asarray(ref),
                               rtol=5e-2, atol=5e-2)
    print("KERNEL_OK")
</pallas_src>

<mosaic_0001>
module attributes {stable_mosaic.version = 11 : i64} {
  func.func @kernel(%arg0: i32, %arg1: i32, %arg2: memref<1x1x288x12xbf16, #tpu.memory_space<vmem>>, %arg3: memref<1x36x128xbf16, #tpu.memory_space<vmem>>, %arg4: memref<1x1x128xf32, #tpu.memory_space<vmem>>, %arg5: memref<1x256x128xbf16, #tpu.memory_space<vmem>>) attributes {dimension_semantics = [#tpu.dimension_semantics<parallel>, #tpu.dimension_semantics<parallel>], iteration_bounds = array<i64: 2, 1>, scalar_prefetch = 0 : i64, scratch_operands = 0 : i64, tpu.core_type = #tpu.core_type<tc>, window_params = [{transform_indices = @transform_0, window_bounds = array<i64: 1, 1, 288, 12>}, {transform_indices = @transform_1, window_bounds = array<i64: 1, 36, 128>}, {transform_indices = @transform_2, window_bounds = array<i64: 1, 1, 128>}, {transform_indices = @transform_3, window_bounds = array<i64: 1, 256, 128>}]} {
    %c0 = arith.constant 0 : index
    %c0_0 = arith.constant 0 : index
    %c0_1 = arith.constant 0 : index
    %c0_2 = arith.constant 0 : index
    %0 = vector.load %arg2[%c0, %c0_0, %c0_1, %c0_2] : memref<1x1x288x12xbf16, #tpu.memory_space<vmem>>, vector<1x1x288x12xbf16>
    %1 = vector.shape_cast %0 : vector<1x1x288x12xbf16> to vector<288x12xbf16>
    %2 = vector.extract_strided_slice %1 {offsets = [0, 0], sizes = [256, 12], strides = [1, 1]} : vector<288x12xbf16> to vector<256x12xbf16>
    %3 = vector.extract_strided_slice %1 {offsets = [16, 0], sizes = [256, 12], strides = [1, 1]} : vector<288x12xbf16> to vector<256x12xbf16>
    %4 = vector.extract_strided_slice %1 {offsets = [32, 0], sizes = [256, 12], strides = [1, 1]} : vector<288x12xbf16> to vector<256x12xbf16>
    %5 = tpu.concatenate %2, %3, %4 in 1 : vector<256x12xbf16>, vector<256x12xbf16>, vector<256x12xbf16> -> vector<256x36xbf16>
    %c0_3 = arith.constant 0 : index
    %c0_4 = arith.constant 0 : index
    %c0_5 = arith.constant 0 : index
    %6 = vector.load %arg3[%c0_3, %c0_4, %c0_5] : memref<1x36x128xbf16, #tpu.memory_space<vmem>>, vector<1x36x128xbf16>
    %7 = vector.shape_cast %6 : vector<1x36x128xbf16> to vector<36x128xbf16>
    %cst = arith.constant dense<0.000000e+00> : vector<256x128xf32>
    %8 = tpu.matmul %5, %7, %cst {dimension_numbers = #tpu.dot_dimension_numbers<[1], [0], [0], [1], [0, 0, 1, 1], [], []>} : vector<256x36xbf16>, vector<36x128xbf16>, vector<256x128xf32> -> vector<256x128xf32>
    %c0_6 = arith.constant 0 : index
    %c0_7 = arith.constant 0 : index
    %c0_8 = arith.constant 0 : index
    %9 = vector.load %arg4[%c0_6, %c0_7, %c0_8] : memref<1x1x128xf32, #tpu.memory_space<vmem>>, vector<1x1x128xf32>
    %10 = vector.shape_cast %9 : vector<1x1x128xf32> to vector<1x128xf32>
    %11 = vector.broadcast %10 : vector<1x128xf32> to vector<256x128xf32>
    %12 = arith.addf %8, %11 : vector<256x128xf32>
    %13 = arith.truncf %12 : vector<256x128xf32> to vector<256x128xbf16>
    %c0_9 = arith.constant 0 : index
    %c0_10 = arith.constant 0 : index
    %c0_11 = arith.constant 0 : index
    %14 = vector.load %arg5[%c0_9, %c0_10, %c0_11] : memref<1x256x128xbf16, #tpu.memory_space<vmem>>, vector<1x256x128xbf16>
    %15 = vector.shape_cast %14 : vector<1x256x128xbf16> to vector<256x128xbf16>
    %16 = vector.shape_cast %13 : vector<256x128xbf16> to vector<1x256x128xbf16>
    tpu.vector_store %arg5[%c0_9, %c0_10, %c0_11], %16 {strides = array<i32>} : memref<1x256x128xbf16, #tpu.memory_space<vmem>>, vector<1x256x128xbf16>,
    return
  }
  func.func @transform_0(%arg0: i32, %arg1: i32) -> (i32, i32, i32, i32) {
    %c0_i32 = arith.constant 0 : i32
    %c0_i32_0 = arith.constant 0 : i32
    %c0_i32_1 = arith.constant 0 : i32
    return %arg0, %arg1, %c0_i32, %c0_i32_0 : i32, i32, i32, i32
  }
  func.func @transform_1(%arg0: i32, %arg1: i32) -> (i32, i32, i32) {
    %c0_i32 = arith.constant 0 : i32
    %c0_i32_0 = arith.constant 0 : i32
    %c0_i32_1 = arith.constant 0 : i32
    return %arg0, %c0_i32, %c0_i32_0 : i32, i32, i32
  }
  func.func @transform_2(%arg0: i32, %arg1: i32) -> (i32, i32, i32) {
    %c0_i32 = arith.constant 0 : i32
    %c0_i32_0 = arith.constant 0 : i32
    %c0_i32_1 = arith.constant 0 : i32
    return %arg0, %c0_i32, %c0_i32_0 : i32, i32, i32
  }
  func.func @transform_3(%arg0: i32, %arg1: i32) -> (i32, i32, i32) {
    %c0_i32 = arith.constant 0 : i32
    %c0_i32_0 = arith.constant 0 : i32
    return %arg0, %arg1, %c0_i32 : i32, i32, i32
  }
}

</mosaic_0001>

<bundles_post_ra>
// kernel: tpu_custom_call.1
= control target key start
LH: loop header
LB: loop body
LE: loop exit
PB: predicated region body
PF: predicated region fallthrough
CT: control target
= control target key end

     0   :  { %8 = vsyncpa [#allocation3], 0  ;;  %s1824_s0 = inlined_call_operand.vmem [shape: bf16[2,1,288,12], index: 0, kind: input, shape index: {}]   ;;  %s1825_s1 = inlined_call_operand.vmem [shape: bf16[2,36,128], index: 1, kind: input, shape index: {}]   ;;  %s1826_s2 = inlined_call_operand.vmem [shape: f32[2,1,128], index: 2, kind: input, shape index: {}]   ;;  %s1827_s3 = inlined_call_operand.hbm [shape: bf16[2,256,128], index: 3, kind: output, shape index: {}]  }
   0x1   :  { %10 = vsyncpa [#allocation3 + $0x1], 0  ;;  %s1472_s12 = smov 0   ;;  %s1474_s13 = smov 0  }
   0x2   :  { %s1476_s14 = smov 0   ;;  %s1478_s15 = smov 0  }
   0x3   :  { %s1480_s16 = smov 0   ;;  %s1482_s17 = smov 0  }
   0x4 LB: > { %s1009_s18 = sadd.s32 4294967295, %s1445_s17   ;;  %s1010_s19 = sadd.s32 4294967294, %s1445_s17   ;;  %s1445_s17 = sphi %s1482_s17, %s16_s17   ;;  %s1441_s16 = sphi %s1480_s16, %s1834_s16   ;;  %s1437_s15 = sphi %s1478_s15, %s1833_s15   ;;  %s1433_s14 = sphi %s1476_s14, %s1832_s14   ;;  %s1429_s13 = sphi %s1474_s13, %s1831_s13   ;;  %s1425_s12 = sphi %s1472_s12, %s1830_s12  }
   0x5   : > { %s28_s20 = sadd.s32 1, %s1441_s16  ;;  %s117_s21 = sadd.s32 1, %s1433_s14 }
   0x6   : > { %p30_p0 = scmp.ge.s32.totalorder %s28_s20, 2  ;;  %p127_p1 = scmp.ne.s32.totalorder %s1433_s14, %s1429_s13 }
   0x7   : > { %p128_p2 = scmp.eq.s32.totalorder %s1009_s18, 1  ;;  %p133_p3 = scmp.ne.s32.totalorder %s1429_s13, %s1425_s12 }
   0x8   : > { %s1836_s20 = smov (%p30_p0, %s28_s20), 0  ;;  %p134_p5 = scmp.eq.s32.totalorder %s1010_s19, 1 }
   0x9   : > { %p1512_p4 = por %p128_p2, %p127_p1  ;;  %s112_s23 = ssub.s32 %s1441_s16, %s1836_s20 }
   0xa   : > { %p1013_p6 = scmp.ge.s32.totalorder %s1445_s17, 1  ;;  %p115_p7 = scmp.eq.s32.totalorder %s112_s23, 0 }
   0xb   : > { %p1519_p8 = por %p134_p5, %p133_p3  ;;  %p178_p9 = scmp.lt.s32.totalorder %s1445_s17, 3 }
   0xc   : > { %s1525_s25 = scalar_select %p115_p7, %s1433_s14, %s117_s21  }
   0xd   : > { %p179_p10 = pnand %p1013_p6, %p178_p9 }
   0xe   : > { %p214_p11 = scmp.lt.s32.totalorder (!%p179_p10), %s1437_s15, 1  ;;  %s1447_s4 = smov (!%p179_p10), 12   ;;  %vm565_vm0 = vcmask (!%p179_p10), 1041408   ;;  %vm423_vm1 = vcmask (!%p179_p10), 97280   ;;  %vm472_vm2 = vcmask (!%p179_p10), 195584   ;;  %vm532_vm3 = vcmask (!%p179_p10), 293888  }
   0xf   : > { %182 = sbr.rel (%p179_p10) target bundleno = 438 (0x1b6), region = 32  ;;  %s1448_s5 = smov (!%p179_p10), 24  }
  0x10   : > { %s211_s19 = sand.u32 (!%p179_p10), 1, %s1429_s13  }
  0x11   : > { %s1014_s21 = sshll.u32 (!%p179_p10), %s211_s19, 7 }
  0x12   : > { %s1725_s23 = scalar_lea.vmem (!%p179_p10), [#allocation2], %s1014_s21 }
  0x16   : > { %s1529_s26 = scalar_select %p214_p11, %s1437_s15, 1 }
  0x18   : > { %s1285_s27 = smul.u32 144, %s1529_s26  ;;  %s230_s18 = scalar_lea.vmem %s1826_s2, %s1529_s26 }
  0x19   : > { %s1286_s6 = smul.u32 20, %s1529_s26  ;;  %s1124_s26 = sshll.u32 %s1437_s15, 11 }
  0x1a   : > { %s1535_s30 = scalar_lea.vmem %s1824_s0, %s1285_s27  ;;  %s906_s27 = sshll.u32 %s1725_s23, 4  ;;  %s1770_s27 = int_to_ptr.vmem [resolvable:$true] %s906_s27 }
  0x1b   : > { %v1538_v0 = vld [vmem:[%s1535_s30 + $0x10] sm:$0xff]   ;;  %v1541_v1 = vld [vmem:[%s1535_s30 + $0x8] sm:$0xff]   ;;  %v1560_v4 = vld [vmem:[%s1535_s30 + $0x58] sm:$0xff]   ;;  %s227_s9 = scalar_lea.vmem %s1825_s1, %s1286_s6  ;;  %s1778_s15 = scalar_lea.sflag [#allocation3], %s211_s19 }
  0x1c   : > { %356 = vrot.lane.b32.xlu1 %v1538_v0, %s1447_s4  ;;  %v1546_v2 = vld [vmem:[%s1535_s30 + $0x50] sm:$0xff]   ;;  %354 = vrot.lane.b32.xlu0 %v1541_v1, %s1447_s4  ;;  %v1551_v3 = vld [vmem:[%s1535_s30 + $0x48] sm:$0xff]  }
  0x1d   : > { %v1565_v5 = vld [vmem:[%s1535_s30 + $0x18] sm:$0xff]   ;;  %v1576_v6 = vld [vmem:[%s1535_s30 + $0x60] sm:$0xff]   ;;  %v1365_v9 = vld [vmem:[%s227_s9 + $0x8] sm:$0xff]  }
  0x1e   : > { %v1579_v7 = vld [vmem:[%s1535_s30 + $0x20] sm:$0xff]   ;;  %v1366_v10 = vld [vmem:[%s227_s9 + $0x10] ss:$0 sps:$4 sm:$0x33]   ;;  %v1592_v11 = vld [vmem:[%s1535_s30 + $0x68] sm:$0xff]  }
  0x1f   : > { %v1364_v8 = vld [vmem:[%s227_s9] sm:$0xff]   ;;  %v567_v12 = vsel %vm565_vm0, %v1366_v10, 0  ;;  %v1597_v13 = vld [vmem:[%s1535_s30 + $0x28] sm:$0xff]   ;;  %v1606_v14 = vld [vmem:[%s1535_s30 + $0x70] sm:$0xff]  }
  0x20   : > { %372 = vrot.lane.b32.xlu1 %v1546_v2, %s1447_s4  ;;  %370 = vrot.lane.b32.xlu0 %v1551_v3, %s1447_s4  ;;  %v1611_v15 = vld [vmem:[%s1535_s30 + $0x30] sm:$0xff]   ;;  %v1620_v16 = vld [vmem:[%s1535_s30 + $0x78] sm:$0xff]  }
  0x21   : > { %1239 = vmatprep.subr.bf16.mxu0 %v1364_v8  ;;  %1277 = vmatprep.subr.bf16.mxu1 %v1364_v8  ;;  %v1625_v17 = vld [vmem:[%s1535_s30 + $0x38] sm:$0xff]   ;;  %v1360_v18 = vld [vmem:[%s1535_s30 + $0x80] sm:$0xff]   ;;  %v1362_v20 = vld [vmem:[%s1535_s30 + $0x88] sm:$0xff]  }
  0x22   : > { %1240 = vmatpush3.bf16.msra.mxu0 %v1364_v8  ;;  %1280 = vmatpush3.bf16.msra.mxu1 %v1364_v8  ;;  %v1361_v19 = vld [vmem:[%s1535_s30 + $0x40] sm:$0xff]  }
  0x23   : > { %1241 = vmatprep.subr.bf16.mxu0 %v1365_v9  ;;  %1278 = vmatprep.subr.bf16.mxu1 %v1365_v9  ;;  %v1363_v24 = vld [vmem:[%s1535_s30] sm:$0xff]   ;;  %s1768_s30 = scalar_lea.hbm %s1827_s3, %s1124_s26 }
  0x24   : > { %407 = vrot.lane.b32.xlu1 %v1546_v2, %s1448_s5  ;;  %391 = vrot.lane.b32.xlu0 %v1538_v0, %s1448_s5 }
  0x26   : > { %1242 = vmatpush3.bf16.msra.mxu0 %v1365_v9  ;;  %1281 = vmatpush3.bf16.msra.mxu1 %v1365_v9 }
  0x27   : > { %1283 = vmatprep.subr.msk.bf16.mxu0 %vm565_vm0, %v1366_v10  ;;  %1284 = vmatprep.subr.msk.bf16.mxu1 %vm565_vm0, %v1366_v10 }
  0x28   : > { %409 = vrot.lane.b32.xlu1 %v1560_v4, %s1448_s5  ;;  %393 = vrot.lane.b32.xlu0 %v1565_v5, %s1448_s5 }
  0x2a   : > { %1244 = vmatpush3.bf16.msra.mxu0 %v567_v12  ;;  %1282 = vmatpush3.bf16.msra.mxu1 %v567_v12 }
  0x2c   : > { %374 = vrot.lane.b32.xlu1 %v1560_v4, %s1447_s4  ;;  %358 = vrot.lane.b32.xlu0 %v1565_v5, %s1447_s4 }
  0x30   : > { %376 = vrot.lane.b32.xlu1 %v1576_v6, %s1447_s4  ;;  %360 = vrot.lane.b32.xlu0 %v1579_v7, %s1447_s4 }
  0x34   : > { %411 = vrot.lane.b32.xlu1 %v1576_v6, %s1448_s5  ;;  %395 = vrot.lane.b32.xlu0 %v1579_v7, %s1448_s5 }
  0x38   : > { %413 = vrot.lane.b32.xlu1 %v1592_v11, %s1448_s5  ;;  %397 = vrot.lane.b32.xlu0 %v1597_v13, %s1448_s5 }
  0x3c   : > { %378 = vrot.lane.b32.xlu1 %v1592_v11, %s1447_s4  ;;  %362 = vrot.lane.b32.xlu0 %v1597_v13, %s1447_s4 }
  0x40   : > { %380 = vrot.lane.b32.xlu1 %v1606_v14, %s1447_s4  ;;  %364 = vrot.lane.b32.xlu0 %v1611_v15, %s1447_s4 }
  0x44   : > { %415 = vrot.lane.b32.xlu1 %v1606_v14, %s1448_s5  ;;  %399 = vrot.lane.b32.xlu0 %v1611_v15, %s1448_s5 }
  0x48   : > { %417 = vrot.lane.b32.xlu1 %v1620_v16, %s1448_s5  ;;  %401 = vrot.lane.b32.xlu0 %v1625_v17, %s1448_s5 }
  0x4c   : > { %382 = vrot.lane.b32.xlu1 %v1620_v16, %s1447_s4  ;;  %366 = vrot.lane.b32.xlu0 %v1625_v17, %s1447_s4 }
  0x50   : > { %384 = vrot.lane.b32.xlu1 %v1360_v18, %s1447_s4  ;;  %368 = vrot.lane.b32.xlu0 %v1361_v19, %s1447_s4  ;;  %s1367_s4 = scalar_lea.vmem %s1770_s27, 2048 }
  0x51   : > { %p1368_p12 = scmp.ne.s32.totalorder %s1770_s27, %s1367_s4 }
  0x53   : > { %p1369_p13 = pnand %p1368_p12, %p1512_p4 }
  0x54   : > { %419 = vrot.lane.b32.xlu1 %v1360_v18, %s1448_s5  ;;  %403 = vrot.lane.b32.xlu0 %v1361_v19, %s1448_s5 }
  0x55   : > { %p1370_p0 = pneg %p1369_p13 }
  0x58   : > { %421 = vrot.lane.b32.xlu1 %v1362_v20, %s1448_s5  ;;  %405 = vrot.lane.b32.xlu0 %v1551_v3, %s1448_s5  ;;  %s1449_s5 = smov [#allocation2]  }
  0x59   : > { %s1371_s6 = sshll.u32 %s1449_s5, 4  ;;  %s1372_s6 = int_to_ptr.vmem [resolvable:$false] %s1371_s6 }
  0x5a   : > { %s1373_s7 = scalar_lea.vmem %s1372_s6, 4096  ;;  %p1374_p1 = scmp.lt.s32.totalorder %s1770_s27, %s1372_s6 }
  0x5b   : > { %p1375_p2 = scmp.lt.s32.totalorder %s1373_s7, %s1367_s4 }
  0x5d   : > { %p1376_p3 = por %p1375_p2, %p1374_p1 }
  0x5f   : > { %p1377_p5 = pnand %p1376_p3, %p1370_p0 }
  0x8e   : > { %v357_v21 = vpop.permute.xlu1 %356  ;;  %v355_v22 = vpop.permute.xlu0 %354 }
  0x8f   : > { %v426_v28 = vsel %vm423_vm1, %v1363_v24, %v355_v22  ;;  %v429_v34 = vsel %vm423_vm1, %v1541_v1, %v357_v21  ;;  %v1712_v24 = vld [vmem:[%s230_s18] ss:$0 sm:$0xff] }
  0x92   : > { %v373_v23 = vpop.permute.xlu1 %372  ;;  %v371_v25 = vpop.permute.xlu0 %370 }
  0x93   : > { %v450_v26 = vsel %vm423_vm1, %v1361_v19, %v371_v25  ;;  %v453_v32 = vsel %vm423_vm1, %v1551_v3, %v373_v23 }
  0x96   : > { %v408_v27 = vpop.permute.xlu1 %407  ;;  %v392_v29 = vpop.permute.xlu0 %391 }
  0x97   : > { %v490_v30 = vsel %vm472_vm2, %v450_v26, %v408_v27  ;;  %v474_v31 = vsel %vm472_vm2, %v426_v28, %v392_v29 }
  0x98   : > { %1261 = vmatprep.mubr.msk.bf16.mxu1 %vm532_vm3, %v490_v30  ;;  %1245 = vmatprep.mubr.msk.bf16.mxu0 %vm532_vm3, %v474_v31 }
  0x9a   : > { %v410_v33 = vpop.permute.xlu1 %409  ;;  %v394_v36 = vpop.permute.xlu0 %393 }
  0x9b   : > { %v492_v35 = vsel %vm472_vm2, %v453_v32, %v410_v33  ;;  %v476_v37 = vsel %vm472_vm2, %v429_v34, %v394_v36 }
  0x9c   : > { %1262 = vmatmul.mubr.msk.bf16.vlgmr.msra.gmra.mrb[0].mxu1 %vm532_vm3, %v492_v35  ;;  %1246 = vmatmul.mubr.msk.bf16.vlgmr.msra.gmra.mrb[0].mxu0 %vm532_vm3, %v476_v37 }
  0x9e   : > { %v375_v38 = vpop.permute.xlu1 %374  ;;  %v359_v39 = vpop.permute.xlu0 %358 }
  0x9f   : > { %v456_v42 = vsel %vm423_vm1, %v1546_v2, %v375_v38  ;;  %v432_v44 = vsel %vm423_vm1, %v1538_v0, %v359_v39 }
  0xa2   : > { %v377_v40 = vpop.permute.xlu1 %376  ;;  %v361_v41 = vpop.permute.xlu0 %360 }
  0xa3   : > { %v459_v48 = vsel %vm423_vm1, %v1560_v4, %v377_v40  ;;  %v435_v50 = vsel %vm423_vm1, %v1565_v5, %v361_v41 }
  0xa6   : > { %v412_v43 = vpop.permute.xlu1 %411  ;;  %v396_v46 = vpop.permute.xlu0 %395 }
  0xa7   : > { %v494_v45 = vsel %vm472_vm2, %v456_v42, %v412_v43  ;;  %v478_v47 = vsel %vm472_vm2, %v432_v44, %v396_v46 }
  0xa8   : > { %1265 = vmatprep.mubr.msk.bf16.mxu1 %vm532_vm3, %v494_v45  ;;  %1249 = vmatprep.mubr.msk.bf16.mxu0 %vm532_vm3, %v478_v47 }
  0xaa   : > { %v414_v49 = vpop.permute.xlu1 %413  ;;  %v398_v52 = vpop.permute.xlu0 %397 }
  0xab   : > { %v496_v51 = vsel %vm472_vm2, %v459_v48, %v414_v49  ;;  %v480_v53 = vsel %vm472_vm2, %v435_v50, %v398_v52 }
  0xac   : > { %1266 = vmatmul.mubr.msk.bf16.gmra.mrb[4].mxu1 %vm532_vm3, %v496_v51  ;;  %1250 = vmatmul.mubr.msk.bf16.gmra.mrb[4].mxu0 %vm532_vm3, %v480_v53 }
  0xae   : > { %v379_v54 = vpop.permute.xlu1 %378  ;;  %v363_v55 = vpop.permute.xlu0 %362 }
  0xaf   : > { %v462_v58 = vsel %vm423_vm1, %v1576_v6, %v379_v54  ;;  %v438_v60 = vsel %vm423_vm1, %v1579_v7, %v363_v55 }
  0xb2   : > { %v381_v56 = vpop.permute.xlu1 %380  ;;  %v365_v57 = vpop.permute.xlu0 %364 }
  0xb3   : > { %v465_v0 = vsel %vm423_vm1, %v1592_v11, %v381_v56  ;;  %v441_v2 = vsel %vm423_vm1, %v1597_v13, %v365_v57 }
  0xb6   : > { %v416_v59 = vpop.permute.xlu1 %415  ;;  %v400_v62 = vpop.permute.xlu0 %399 }
  0xb7   : > { %v498_v61 = vsel %vm472_vm2, %v462_v58, %v416_v59  ;;  %v482_v63 = vsel %vm472_vm2, %v438_v60, %v400_v62 }
  0xb8   : > { %1269 = vmatprep.mubr.msk.bf16.mxu1 %vm532_vm3, %v498_v61  ;;  %1253 = vmatprep.mubr.msk.bf16.mxu0 %vm532_vm3, %v482_v63 }
  0xba   : > { %v418_v1 = vpop.permute.xlu1 %417  ;;  %v402_v4 = vpop.permute.xlu0 %401 }
  0xbb   : > { %v500_v3 = vsel %vm472_vm2, %v465_v0, %v418_v1  ;;  %v484_v5 = vsel %vm472_vm2, %v441_v2, %v402_v4 }
  0xbc   : > { %1270 = vmatmul.mubr.msk.bf16.gmra.mrb[8].mxu1 %vm532_vm3, %v500_v3  ;;  %1254 = vmatmul.mubr.msk.bf16.gmra.mrb[8].mxu0 %vm532_vm3, %v484_v5 }
  0xbe   : > { %v383_v6 = vpop.permute.xlu1 %382  ;;  %v367_v7 = vpop.permute.xlu0 %366 }
  0xbf   : > { %v468_v10 = vsel %vm423_vm1, %v1606_v14, %v383_v6  ;;  %v444_v12 = vsel %vm423_vm1, %v1611_v15, %v367_v7 }
  0xc2   : > { %v385_v8 = vpop.permute.xlu1 %384  ;;  %v369_v9 = vpop.permute.xlu0 %368 }
  0xc3   : > { %v471_v20 = vsel %vm423_vm1, %v1620_v16, %v385_v8  ;;  %v447_v21 = vsel %vm423_vm1, %v1625_v17, %v369_v9 }
  0xc6   : > { %v420_v11 = vpop.permute.xlu1 %419  ;;  %v404_v18 = vpop.permute.xlu0 %403 }
  0xc7   : > { %v502_v13 = vsel %vm472_vm2, %v468_v10, %v420_v11  ;;  %v486_v19 = vsel %vm472_vm2, %v444_v12, %v404_v18 }
  0xc8   : > { %1273 = vmatprep.mubr.msk.bf16.mxu1 %vm532_vm3, %v502_v13  ;;  %1257 = vmatprep.mubr.msk.bf16.mxu0 %vm532_vm3, %v486_v19 }
  0xca   : > { %v422_v14 = vpop.permute.xlu1 %421  ;;  %v406_v22 = vpop.permute.xlu0 %405 }
  0xcb   : > { %v504_v15 = vsel %vm472_vm2, %v471_v20, %v422_v14  ;;  %v488_v23 = vsel %vm472_vm2, %v447_v21, %v406_v22 }
  0xcc   : > { %1274 = vmatmul.mubr.msk.bf16.gmra.mrb[12].mxu1 %vm532_vm3, %v504_v15  ;;  %1258 = vmatmul.mubr.msk.bf16.gmra.mrb[12].mxu0 %vm532_vm3, %v488_v23 }
 0x16f   : > { %v1263_v16 = vpop.f32.mrb[0].mxu1  ;;  %v1247_v25 = vpop.f32.mrb[0].mxu0 }
 0x170   : > { %v676_v17 = vadd.f32 %v1263_v16, %v1712_v24  ;;  %v667_v26 = vpop.f32.mrb[1].mxu1  ;;  %v612_v27 = vadd.f32 %v1247_v25, %v1712_v24  ;;  %v603_v28 = vpop.f32.mrb[1].mxu0 }
 0x171   : > { %v668_v29 = vadd.f32 %v1712_v24, %v667_v26  ;;  %v1264_v30 = vpop.f32.mrb[2].mxu1  ;;  %v604_v31 = vadd.f32 %v1712_v24, %v603_v28  ;;  %v1248_v32 = vpop.f32.mrb[2].mxu0 }
 0x172   : > { %v679_v33 = vadd.f32 %v1264_v30, %v1712_v24  ;;  %v670_v34 = vpop.f32.mrb[3].mxu1  ;;  %v615_v35 = vadd.f32 %v1248_v32, %v1712_v24  ;;  %v606_v36 = vpop.f32.mrb[3].mxu0 }
 0x173   : > { %v671_v37 = vadd.f32 %v1712_v24, %v670_v34  ;;  %v607_v39 = vadd.f32 %v1712_v24, %v606_v36 }
 0x174   : > { %v1173_v38 = vpack.c.bf16 %v679_v33, %v676_v17  ;;  %v1133_v40 = vpack.c.bf16 %v615_v35, %v612_v27 }
 0x175   : > { %v1168_v41 = vpack.c.bf16 %v671_v37, %v668_v29  ;;  %v1128_v42 = vpack.c.bf16 %v607_v39, %v604_v31 }
 0x176   : > { %1213 = vst [vmem:[%s1725_s23 + $0x48] sm:$0xff] %v1173_v38   ;;  %1205 = vst [vmem:[%s1725_s23 + $0x8] sm:$0xff] %v1133_v40  }
 0x177   : > { %1212 = vst [vmem:[%s1725_s23 + $0x40] sm:$0xff] %v1168_v41   ;;  %1129 = vst [vmem:[%s1725_s23] sm:$0xff] %v1128_v42  }
 0x17f   : > { %v1267_v43 = vpop.f32.mrb[4].mxu1  ;;  %v1251_v44 = vpop.f32.mrb[4].mxu0 }
 0x180   : > { %v692_v45 = vadd.f32 %v1267_v43, %v1712_v24  ;;  %v683_v46 = vpop.f32.mrb[5].mxu1  ;;  %v628_v47 = vadd.f32 %v1251_v44, %v1712_v24  ;;  %v619_v48 = vpop.f32.mrb[5].mxu0 }
 0x181   : > { %v684_v49 = vadd.f32 %v1712_v24, %v683_v46  ;;  %v1268_v50 = vpop.f32.mrb[6].mxu1  ;;  %v620_v51 = vadd.f32 %v1712_v24, %v619_v48  ;;  %v1252_v52 = vpop.f32.mrb[6].mxu0 }
 0x182   : > { %v695_v53 = vadd.f32 %v1268_v50, %v1712_v24  ;;  %v686_v54 = vpop.f32.mrb[7].mxu1  ;;  %v631_v55 = vadd.f32 %v1252_v52, %v1712_v24  ;;  %v622_v56 = vpop.f32.mrb[7].mxu0 }
 0x183   : > { %v687_v57 = vadd.f32 %v1712_v24, %v686_v54  ;;  %v623_v59 = vadd.f32 %v1712_v24, %v622_v56 }
 0x184   : > { %v1183_v58 = vpack.c.bf16 %v695_v53, %v692_v45  ;;  %v1143_v60 = vpack.c.bf16 %v631_v55, %v628_v47 }
 0x185   : > { %v1178_v61 = vpack.c.bf16 %v687_v57, %v684_v49  ;;  %v1138_v62 = vpack.c.bf16 %v623_v59, %v620_v51 }
 0x186   : > { %1215 = vst [vmem:[%s1725_s23 + $0x58] sm:$0xff] %v1183_v58   ;;  %1207 = vst [vmem:[%s1725_s23 + $0x18] sm:$0xff] %v1143_v60  }
 0x187   : > { %1214 = vst [vmem:[%s1725_s23 + $0x50] sm:$0xff] %v1178_v61   ;;  %1206 = vst [vmem:[%s1725_s23 + $0x10] sm:$0xff] %v1138_v62  }
 0x18f   : > { %v1271_v63 = vpop.f32.mrb[8].mxu1  ;;  %v1255_v0 = vpop.f32.mrb[8].mxu0 }
 0x190   : > { %v708_v1 = vadd.f32 %v1271_v63, %v1712_v24  ;;  %v699_v2 = vpop.f32.mrb[9].mxu1  ;;  %v644_v3 = vadd.f32 %v1255_v0, %v1712_v24  ;;  %v635_v4 = vpop.f32.mrb[9].mxu0 }
 0x191   : > { %v700_v5 = vadd.f32 %v1712_v24, %v699_v2  ;;  %v1272_v6 = vpop.f32.mrb[10].mxu1  ;;  %v636_v7 = vadd.f32 %v1712_v24, %v635_v4  ;;  %v1256_v8 = vpop.f32.mrb[10].mxu0 }
 0x192   : > { %v711_v9 = vadd.f32 %v1272_v6, %v1712_v24  ;;  %v702_v10 = vpop.f32.mrb[11].mxu1  ;;  %v647_v11 = vadd.f32 %v1256_v8, %v1712_v24  ;;  %v638_v12 = vpop.f32.mrb[11].mxu0 }
 0x193   : > { %v703_v13 = vadd.f32 %v1712_v24, %v702_v10  ;;  %v639_v19 = vadd.f32 %v1712_v24, %v638_v12 }
 0x194   : > { %v1193_v18 = vpack.c.bf16 %v711_v9, %v708_v1  ;;  %v1153_v20 = vpack.c.bf16 %v647_v11, %v644_v3 }
 0x195   : > { %v1188_v14 = vpack.c.bf16 %v703_v13, %v700_v5  ;;  %v1148_v21 = vpack.c.bf16 %v639_v19, %v636_v7 }
 0x196   : > { %1217 = vst [vmem:[%s1725_s23 + $0x68] sm:$0xff] %v1193_v18   ;;  %1209 = vst [vmem:[%s1725_s23 + $0x28] sm:$0xff] %v1153_v20  }
 0x197   : > { %1216 = vst [vmem:[%s1725_s23 + $0x60] sm:$0xff] %v1188_v14   ;;  %1208 = vst [vmem:[%s1725_s23 + $0x20] sm:$0xff] %v1148_v21  }
 0x19f   : > { %v1275_v15 = vpop.f32.mrb[12].mxu1  ;;  %v1259_v22 = vpop.f32.mrb[12].mxu0 }
 0x1a0   : > { %v724_v23 = vadd.f32 %v1275_v15, %v1712_v24  ;;  %v715_v16 = vpop.f32.mrb[13].mxu1  ;;  %v660_v25 = vadd.f32 %v1259_v22, %v1712_v24  ;;  %v651_v17 = vpop.f32.mrb[13].mxu0 }
 0x1a1   : > { %v716_v26 = vadd.f32 %v1712_v24, %v715_v16  ;;  %v1276_v27 = vpop.f32.mrb[14].mxu1  ;;  %v652_v28 = vadd.f32 %v1712_v24, %v651_v17  ;;  %v1260_v29 = vpop.f32.mrb[14].mxu0 }
 0x1a2   : > { %v727_v30 = vadd.f32 %v1276_v27, %v1712_v24  ;;  %v718_v31 = vpop.f32.mrb[15].mxu1  ;;  %v663_v32 = vadd.f32 %v1260_v29, %v1712_v24  ;;  %v654_v33 = vpop.f32.mrb[15].mxu0 }
 0x1a3   : > { %v719_v34 = vadd.f32 %v1712_v24, %v718_v31  ;;  %v655_v36 = vadd.f32 %v1712_v24, %v654_v33 }
 0x1a4   : > { %v1203_v35 = vpack.c.bf16 %v727_v30, %v724_v23  ;;  %v1163_v37 = vpack.c.bf16 %v663_v32, %v660_v25 }
 0x1a5   : > { %v1198_v38 = vpack.c.bf16 %v719_v34, %v716_v26  ;;  %v1158_v39 = vpack.c.bf16 %v655_v36, %v652_v28 }
 0x1a6   : > { %1219 = vst [vmem:[%s1725_s23 + $0x78] sm:$0xff] %v1203_v35   ;;  %1211 = vst [vmem:[%s1725_s23 + $0x38] sm:$0xff] %v1163_v37  }
 0x1a7   : > { %1218 = vst [vmem:[%s1725_s23 + $0x70] sm:$0xff] %v1198_v38   ;;  %1210 = vst [vmem:[%s1725_s23 + $0x30] sm:$0xff] %v1158_v39  }
 0x1a8   : > { %1380 = shalt.err (!%p1377_p5)
}
 0x1a9   : > { %s1381_s8 = scalar_lea.hbm %s1768_s30, 2048  ;;  %s1385_s11 = scalar_lea.hbm %s1827_s3, 4096 }
 0x1aa   : > { %p1382_p6 = scmp.ne.s32.totalorder %s1768_s30, %s1381_s8  ;;  %p1386_p10 = scmp.lt.u32.totalorder %s1768_s30, %s1827_s3 }
 0x1ab   : > { %p1387_p11 = scmp.lt.u32.totalorder %s1385_s11, %s1381_s8  ;;  %p1389_p13 = scmp.lt.u32.totalorder %s1381_s8, %s1768_s30 }
 0x1ac   : > { %p1383_p7 = pnand %p1382_p6, %p1512_p4 }
 0x1ad   : > { %p1388_p12 = por %p1387_p11, %p1386_p10 }
 0x1ae   : > { %p1384_p9 = pneg %p1383_p7 }
 0x1af   : > { %p1390_p0 = por %p1389_p13, %p1388_p12 }
 0x1b1   : > { %p1391_p1 = pnand %p1390_p0, %p1384_p9 }
 0x1b3   : > { %1394 = shalt.err (!%p1391_p1)
}
 0x1b4   : > { %s1450_s21 = smov 64   ;;  %s1451_s23 = smov 4  }
 0x1b5   : > { %1287 = dma.vmem_to_hbm [thread:$0]  (%p1512_p4), %s1770_s27, 2048, %s1768_s30, %s1778_s15, %s1450_s21, %s1450_s21, %s1451_s23  }
 0x1b6 PF: > { %p1293_p2 = scmp.ge.s32.totalorder %s1445_s17, 2  ;;  %s921_s26 = sand.u32 1, %s1425_s12  }
 0x1b7   : > { %s922_s28 = scalar_lea.sflag [#allocation3], %s921_s26 }
 0x1b8   : > { %p1290_p3 = pnand %p1293_p2, %p1519_p8 }
 0x1ba   : > { %1420 = dma.done.wait (!%p1290_p3), %s922_s28, 2048  }
 0x1bb   : > { %1422 = vsyncadd (!%p1290_p3), %s922_s28, 4294965248  ;;  %s16_s17 = sadd.s32 1, %s1445_s17   ;;  %s1830_s12 = smov %s1429_s13 }
 0x1bc   : > { %p13_p5 = scmp.ge.s32.totalorder %s16_s17, 4   ;;  %s1831_s13 = smov %s1433_s14 }
 0x1bd   : > { %s1832_s14 = smov %s1525_s25  ;;  %s1833_s15 = smov %s1441_s16 }
 0x1be   : > { %s1834_s16 = smov %s1836_s20  ;;  %15 = sbr.rel (!%p13_p5) target bundleno = 4 (0x4), region = 73 }
 0x1c5   :  { %927 = vsyncpa [#allocation3], 1 }
 0x1c6   :  { %929 = vsyncpa [#allocation3 + $0x1], 1 }

</bundles_post_ra>
